<compile_context>
chip_gen: v7x
topology: tpu7x:2x2x1
jax: 0.10.0
libtpu: 0.0.40
codegen_flags: <defaults>
</compile_context>

<pallas_src>
import functools

import jax
import jax.numpy as jnp
import numpy as np
from jax.experimental import pallas as pl
from jax.experimental.pallas import tpu as pltpu


def _mha_kernel(x_ref, wqkv_ref, bqkv_ref, wo_ref, bo_ref, o_ref, *,
                num_heads, seq_len):
    rows, E = x_ref.shape          # rows = bb * seq_len  (bb batch elements per grid step)
    H, S = num_heads, seq_len
    D = E // H
    bb = rows // S

    x = x_ref[...]                 # (rows, E), f32

    # Fused QKV projection. Column layout (built in the wrapper, head-major):
    #   [h0: q(D) k(D) v(D) | h1: q k v | ...], 1/sqrt(D) already folded into q cols + bias.
    qkv = jnp.dot(x, wqkv_ref[...], preferred_element_type=jnp.float32) + bqkv_ref[...]

    # Pack (batch, head) into one leading batch dim: (bb*H, S, 3D).
    # Only static 2-D slices + a leading-axis stack (no minor-dim reshape/transpose).
    per_head = jnp.stack(
        [qkv[b * S:(b + 1) * S, h * 3 * D:(h + 1) * 3 * D]
         for b in range(bb) for h in range(H)], axis=0)
    q = per_head[:, :, :D]          # (bb*H, S, D), pre-scaled by 1/sqrt(D)
    k = per_head[:, :, D:2 * D]
    v = per_head[:, :, 2 * D:]

    # In-kernel causal mask (row >= col), shared by every (batch, head) slice.
    row_ids = jax.lax.broadcasted_iota(jnp.int32, (S, S), 0)
    col_ids = jax.lax.broadcasted_iota(jnp.int32, (S, S), 1)
    causal = row_ids >= col_ids

    # Batched attention over the (bb*H) leading dim: two MXU einsums + f32 softmax.
    s = jnp.einsum('bqd,bkd->bqk', q, k, preferred_element_type=jnp.float32)
    s = jnp.where(causal[None, :, :], s, jnp.float32(-1e30))
    s = s - jnp.max(s, axis=-1, keepdims=True)
    p = jnp.exp(s)
    denom = jnp.sum(p, axis=-1, keepdims=True)
    p = p * pl.reciprocal(denom, approx=False)        # exact reciprocal on the EUP
    ctx = jnp.einsum('bqk,bkd->bqd', p, v, preferred_element_type=jnp.float32)

    # Re-assemble (rows, E): heads concatenated along lanes, batch row-blocks along rows.
    ctx2d = jnp.concatenate(
        [jnp.concatenate([ctx[b * H + h] for h in range(H)], axis=-1)
         for b in range(bb)], axis=0)

    out = jnp.dot(ctx2d, wo_ref[...], preferred_element_type=jnp.float32) + bo_ref[...]
    o_ref[...] = out.astype(o_ref.dtype)


def masked_causal_attention(x, in_proj_w, in_proj_b, out_proj_w, out_proj_b, num_heads):
    """x: (B, S, E) float32.  Weight layout mirrors torch.nn.MultiheadAttention:
       in_proj_w (3E, E), in_proj_b (3E,), out_proj_w (E, E), out_proj_b (E,)."""
    B, S, E = x.shape
    H = num_heads
    D = E // H
    scale = 1.0 / float(np.sqrt(D))

    wq, wk, wv = in_proj_w[:E], in_proj_w[E:2 * E], in_proj_w[2 * E:]
    bq, bk, bv = in_proj_b[:E], in_proj_b[E:2 * E], in_proj_b[2 * E:]

    # Fused, head-major QKV weight (E, 3E): per head h the columns are [q(D) k(D) v(D)],
    # with the 1/sqrt(D) attention scale folded into the q columns and q bias (host side, free).
    w3 = jnp.stack([wq.T * scale, wk.T, wv.T], axis=1)          # (E, 3, E)
    wqkv = w3.reshape(E, 3, H, D).transpose(0, 2, 1, 3).reshape(E, 3 * E)
    b3 = jnp.stack([bq * scale, bk, bv], axis=0)                # (3, E)
    bqkv = b3.reshape(3, H, D).transpose(1, 0, 2).reshape(1, 3 * E)

    wo_t = out_proj_w.T                                         # (E, E)
    bo = out_proj_b.reshape(1, E)

    # Batch folding: keep >= 2 parallel grid steps (both v7x TensorCores busy) while folding
    # the rest of the batch into each step to amortize per-grid-step overhead on v5e/v6e.
    if B > 2 and B % 2 == 0:
        bb = B // 2
    else:
        bb = 1
    grid = (B // bb,)
    rows = bb * S

    x2d = x.reshape(B * S, E)       # flatten batch into the matmul M dimension (wrapper side)

    kernel = functools.partial(_mha_kernel, num_heads=H, seq_len=S)
    const2d = lambda i: (0, 0)

    out2d = pl.pallas_call(
        kernel,
        out_shape=jax.ShapeDtypeStruct((B * S, E), x.dtype),
        grid=grid,
        in_specs=[
            pl.BlockSpec((rows, E), lambda i: (i, 0)),          # activations for this step
            pl.BlockSpec((E, 3 * E), const2d),                  # fused Wqkv (head-major)
            pl.BlockSpec((1, 3 * E), const2d),                  # fused bias
            pl.BlockSpec((E, E), const2d),                      # Wo^T
            pl.BlockSpec((1, E), const2d),                      # bo
        ],
        out_specs=pl.BlockSpec((rows, E), lambda i: (i, 0)),
        compiler_params=pltpu.CompilerParams(
            dimension_semantics=("parallel",)),
    )(x2d, wqkv, bqkv, wo_t, bo)

    return out2d.reshape(B, S, E)


def _reference(x, in_proj_w, in_proj_b, out_proj_w, out_proj_b, attn_mask, num_heads):
    # Pure-JAX reference with exact nn.MultiheadAttention semantics.
    B, S, E = x.shape
    D = E // num_heads
    wq, wk, wv = in_proj_w[:E], in_proj_w[E:2 * E], in_proj_w[2 * E:]
    bq, bk, bv = in_proj_b[:E], in_proj_b[E:2 * E], in_proj_b[2 * E:]
    q = x @ wq.T + bq
    k = x @ wk.T + bk
    v = x @ wv.T + bv
    q = q.reshape(B, S, num_heads, D).transpose(0, 2, 1, 3)
    k = k.reshape(B, S, num_heads, D).transpose(0, 2, 1, 3)
    v = v.reshape(B, S, num_heads, D).transpose(0, 2, 1, 3)
    scores = jnp.einsum("bhqd,bhkd->bhqk", q, k) / jnp.sqrt(jnp.float32(D))
    scores = scores + attn_mask[None, None, :, :]
    p = jax.nn.softmax(scores, axis=-1)
    ctx = jnp.einsum("bhqk,bhkd->bhqd", p, v).transpose(0, 2, 1, 3).reshape(B, S, E)
    return ctx @ out_proj_w.T + out_proj_b


if __name__ == "__main__":
    B, S, E, H = 2, 8, 32, 4   # batch, seq (== `size`), embed_dim, heads

    key = jax.random.PRNGKey(0)
    kx, kw_in, kb_in, kw_out, kb_out = jax.random.split(key, 5)

    x = jax.random.normal(kx, (B, S, E), dtype=jnp.float32)
    in_proj_w = 0.05 * jax.random.normal(kw_in, (3 * E, E), dtype=jnp.float32)
    in_proj_b = 0.05 * jax.random.normal(kb_in, (3 * E,), dtype=jnp.float32)
    out_proj_w = 0.05 * jax.random.normal(kw_out, (E, E), dtype=jnp.float32)
    out_proj_b = 0.05 * jax.random.normal(kb_out, (E,), dtype=jnp.float32)

    out = masked_causal_attention(x, in_proj_w, in_proj_b, out_proj_w, out_proj_b, H)
    out = jax.block_until_ready(out)

    # Reference uses the explicit additive causal mask, as in the PyTorch module.
    causal = jnp.tril(jnp.ones((S, S), dtype=bool))
    attn_mask = jnp.where(causal, 0.0, -1e30).astype(jnp.float32)
    ref = _reference(x, in_proj_w, in_proj_b, out_proj_w, out_proj_b, attn_mask, H)
    np.testing.assert_allclose(np.asarray(out), np.asarray(ref), rtol=1e-5, atol=1e-5)

    print("KERNEL_OK")
</pallas_src>

<mosaic_0001>
module attributes {stable_mosaic.version = 11 : i64} {
  func.func @_mha_kernel(%arg0: i32, %arg1: memref<8x32xf32, #tpu.memory_space<vmem>>, %arg2: memref<32x96xf32, #tpu.memory_space<vmem>>, %arg3: memref<1x96xf32, #tpu.memory_space<vmem>>, %arg4: memref<32x32xf32, #tpu.memory_space<vmem>>, %arg5: memref<1x32xf32, #tpu.memory_space<vmem>>, %arg6: memref<8x32xf32, #tpu.memory_space<vmem>>) attributes {dimension_semantics = [#tpu.dimension_semantics<parallel>], iteration_bounds = array<i64: 2>, scalar_prefetch = 0 : i64, scratch_operands = 0 : i64, tpu.core_type = #tpu.core_type<tc>, window_params = [{transform_indices = @transform_0, window_bounds = array<i64: 8, 32>}, {pipeline_mode = #tpu.pipeline_mode<synchronous>, transform_indices = @transform_1, window_bounds = array<i64: 32, 96>}, {pipeline_mode = #tpu.pipeline_mode<synchronous>, transform_indices = @transform_2, window_bounds = array<i64: 1, 96>}, {pipeline_mode = #tpu.pipeline_mode<synchronous>, transform_indices = @transform_3, window_bounds = array<i64: 32, 32>}, {pipeline_mode = #tpu.pipeline_mode<synchronous>, transform_indices = @transform_4, window_bounds = array<i64: 1, 32>}, {transform_indices = @transform_5, window_bounds = array<i64: 8, 32>}]} {
    %c0 = arith.constant 0 : index
    %c0_0 = arith.constant 0 : index
    %0 = vector.load %arg1[%c0, %c0_0] : memref<8x32xf32, #tpu.memory_space<vmem>>, vector<8x32xf32>
    %c0_1 = arith.constant 0 : index
    %c0_2 = arith.constant 0 : index
    %1 = vector.load %arg2[%c0_1, %c0_2] : memref<32x96xf32, #tpu.memory_space<vmem>>, vector<32x96xf32>
    %cst = arith.constant dense<0.000000e+00> : vector<8x96xf32>
    %2 = tpu.matmul %0, %1, %cst {dimension_numbers = #tpu.dot_dimension_numbers<[1], [0], [0], [1], [0, 0, 1, 1], [], []>} : vector<8x32xf32>, vector<32x96xf32>, vector<8x96xf32> -> vector<8x96xf32>
    %c0_3 = arith.constant 0 : index
    %c0_4 = arith.constant 0 : index
    %3 = vector.load %arg3[%c0_3, %c0_4] : memref<1x96xf32, #tpu.memory_space<vmem>>, vector<1x96xf32>
    %4 = vector.broadcast %3 : vector<1x96xf32> to vector<8x96xf32>
    %5 = arith.addf %2, %4 : vector<8x96xf32>
    %6 = vector.extract_strided_slice %5 {offsets = [0, 0], sizes = [8, 24], strides = [1, 1]} : vector<8x96xf32> to vector<8x24xf32>
    %7 = vector.extract_strided_slice %5 {offsets = [0, 24], sizes = [8, 24], strides = [1, 1]} : vector<8x96xf32> to vector<8x24xf32>
    %8 = vector.extract_strided_slice %5 {offsets = [0, 48], sizes = [8, 24], strides = [1, 1]} : vector<8x96xf32> to vector<8x24xf32>
    %9 = vector.extract_strided_slice %5 {offsets = [0, 72], sizes = [8, 24], strides = [1, 1]} : vector<8x96xf32> to vector<8x24xf32>
    %10 = vector.shape_cast %6 : vector<8x24xf32> to vector<1x8x24xf32>
    %11 = vector.shape_cast %7 : vector<8x24xf32> to vector<1x8x24xf32>
    %12 = vector.shape_cast %8 : vector<8x24xf32> to vector<1x8x24xf32>
    %13 = vector.shape_cast %9 : vector<8x24xf32> to vector<1x8x24xf32>
    %14 = tpu.concatenate %10, %11, %12, %13 in 0 : vector<1x8x24xf32>, vector<1x8x24xf32>, vector<1x8x24xf32>, vector<1x8x24xf32> -> vector<4x8x24xf32>
    %15 = vector.extract_strided_slice %14 {offsets = [0, 0, 0], sizes = [4, 8, 8], strides = [1, 1, 1]} : vector<4x8x24xf32> to vector<4x8x8xf32>
    %16 = vector.extract_strided_slice %14 {offsets = [0, 0, 8], sizes = [4, 8, 8], strides = [1, 1, 1]} : vector<4x8x24xf32> to vector<4x8x8xf32>
    %17 = vector.extract_strided_slice %14 {offsets = [0, 0, 16], sizes = [4, 8, 8], strides = [1, 1, 1]} : vector<4x8x24xf32> to vector<4x8x8xf32>
    %18 = tpu.iota {dimensions = array<i32: 0>} : vector<8x8xi32>
    %19 = tpu.iota {dimensions = array<i32: 1>} : vector<8x8xi32>
    %20 = arith.cmpi sge, %18, %19 : vector<8x8xi32>
    "tpu.trace_start"() <{level = 10 : i32, message = "bqd,bkd->bqk"}> : () -> ()
    %cst_5 = arith.constant dense<0.000000e+00> : vector<4x8x8xf32>
    %21 = tpu.matmul %15, %16, %cst_5 {dimension_numbers = #tpu.dot_dimension_numbers<[2], [2], [1], [1], [0, 0, 0, 1, 1, 1], [0], [0]>} : vector<4x8x8xf32>, vector<4x8x8xf32>, vector<4x8x8xf32> -> vector<4x8x8xf32>
    "tpu.trace_stop"() : () -> ()
    %22 = vector.shape_cast %20 : vector<8x8xi1> to vector<1x8x8xi1>
    %cst_6 = arith.constant -1.000000e+30 : f32
    %23 = vector.shape_cast %22 : vector<1x8x8xi1> to vector<1x8x8xi1>
    %24 = vector.broadcast %23 : vector<1x8x8xi1> to vector<4x8x8xi1>
    %25 = vector.broadcast %cst_6 : f32 to vector<4x8x8xf32>
    %26 = arith.select %24, %21, %25 : vector<4x8x8xi1>, vector<4x8x8xf32>
    %cst_7 = arith.constant dense<0xFF800000> : vector<4x8xf32>
    %27 = vector.multi_reduction <maximumf>, %26, %cst_7 [2] : vector<4x8x8xf32> to vector<4x8xf32>
    %28 = vector.shape_cast %27 : vector<4x8xf32> to vector<4x8x1xf32>
    %29 = vector.broadcast %28 : vector<4x8x1xf32> to vector<4x8x8xf32>
    %30 = arith.subf %26, %29 : vector<4x8x8xf32>
    %31 = math.exp %30 : vector<4x8x8xf32>
    %cst_8 = arith.constant dense<0.000000e+00> : vector<4x8xf32>
    %32 = vector.multi_reduction <add>, %31, %cst_8 [2] : vector<4x8x8xf32> to vector<4x8xf32>
    %33 = vector.shape_cast %32 : vector<4x8xf32> to vector<4x8x1xf32>
    %34 = tpu.reciprocal %33 : vector<4x8x1xf32> -> vector<4x8x1xf32>
    %35 = vector.broadcast %34 : vector<4x8x1xf32> to vector<4x8x8xf32>
    %36 = arith.mulf %31, %35 : vector<4x8x8xf32>
    "tpu.trace_start"() <{level = 10 : i32, message = "bqk,bkd->bqd"}> : () -> ()
    %cst_9 = arith.constant dense<0.000000e+00> : vector<4x8x8xf32>
    %37 = tpu.matmul %36, %17, %cst_9 {dimension_numbers = #tpu.dot_dimension_numbers<[2], [1], [1], [2], [0, 0, 0, 1, 1, 2], [0], [0]>} : vector<4x8x8xf32>, vector<4x8x8xf32>, vector<4x8x8xf32> -> vector<4x8x8xf32>
    "tpu.trace_stop"() : () -> ()
    %38 = vector.extract_strided_slice %37 {offsets = [0, 0, 0], sizes = [1, 8, 8], strides = [1, 1, 1]} : vector<4x8x8xf32> to vector<1x8x8xf32>
    %39 = vector.shape_cast %38 : vector<1x8x8xf32> to vector<8x8xf32>
    %40 = vector.extract_strided_slice %37 {offsets = [1, 0, 0], sizes = [1, 8, 8], strides = [1, 1, 1]} : vector<4x8x8xf32> to vector<1x8x8xf32>
    %41 = vector.shape_cast %40 : vector<1x8x8xf32> to vector<8x8xf32>
    %42 = vector.extract_strided_slice %37 {offsets = [2, 0, 0], sizes = [1, 8, 8], strides = [1, 1, 1]} : vector<4x8x8xf32> to vector<1x8x8xf32>
    %43 = vector.shape_cast %42 : vector<1x8x8xf32> to vector<8x8xf32>
    %44 = vector.extract_strided_slice %37 {offsets = [3, 0, 0], sizes = [1, 8, 8], strides = [1, 1, 1]} : vector<4x8x8xf32> to vector<1x8x8xf32>
    %45 = vector.shape_cast %44 : vector<1x8x8xf32> to vector<8x8xf32>
    %46 = tpu.concatenate %39, %41, %43, %45 in 1 : vector<8x8xf32>, vector<8x8xf32>, vector<8x8xf32>, vector<8x8xf32> -> vector<8x32xf32>
    %c0_10 = arith.constant 0 : index
    %c0_11 = arith.constant 0 : index
    %47 = vector.load %arg4[%c0_10, %c0_11] : memref<32x32xf32, #tpu.memory_space<vmem>>, vector<32x32xf32>
    %cst_12 = arith.constant dense<0.000000e+00> : vector<8x32xf32>
    %48 = tpu.matmul %46, %47, %cst_12 {dimension_numbers = #tpu.dot_dimension_numbers<[1], [0], [0], [1], [0, 0, 1, 1], [], []>} : vector<8x32xf32>, vector<32x32xf32>, vector<8x32xf32> -> vector<8x32xf32>
    %c0_13 = arith.constant 0 : index
    %c0_14 = arith.constant 0 : index
    %49 = vector.load %arg5[%c0_13, %c0_14] : memref<1x32xf32, #tpu.memory_space<vmem>>, vector<1x32xf32>
    %50 = vector.broadcast %49 : vector<1x32xf32> to vector<8x32xf32>
    %51 = arith.addf %48, %50 : vector<8x32xf32>
    %c0_15 = arith.constant 0 : index
    %c0_16 = arith.constant 0 : index
    %52 = vector.load %arg6[%c0_15, %c0_16] : memref<8x32xf32, #tpu.memory_space<vmem>>, vector<8x32xf32>
    tpu.vector_store %arg6[%c0_15, %c0_16], %51 {strides = array<i32>} : memref<8x32xf32, #tpu.memory_space<vmem>>, vector<8x32xf32>,
    return
  }
  func.func @transform_0(%arg0: i32) -> (i32, i32) {
    %c0_i32 = arith.constant 0 : i32
    %c0_i32_0 = arith.constant 0 : i32
    return %arg0, %c0_i32 : i32, i32
  }
  func.func @transform_1(%arg0: i32) -> (i32, i32) {
    %c0_i32 = arith.constant 0 : i32
    %c0_i32_0 = arith.constant 0 : i32
    %c0_i32_1 = arith.constant 0 : i32
    return %c0_i32, %c0_i32_0 : i32, i32
  }
  func.func @transform_2(%arg0: i32) -> (i32, i32) {
    %c0_i32 = arith.constant 0 : i32
    %c0_i32_0 = arith.constant 0 : i32
    %c0_i32_1 = arith.constant 0 : i32
    return %c0_i32, %c0_i32_0 : i32, i32
  }
  func.func @transform_3(%arg0: i32) -> (i32, i32) {
    %c0_i32 = arith.constant 0 : i32
    %c0_i32_0 = arith.constant 0 : i32
    %c0_i32_1 = arith.constant 0 : i32
    return %c0_i32, %c0_i32_0 : i32, i32
  }
  func.func @transform_4(%arg0: i32) -> (i32, i32) {
    %c0_i32 = arith.constant 0 : i32
    %c0_i32_0 = arith.constant 0 : i32
    %c0_i32_1 = arith.constant 0 : i32
    return %c0_i32, %c0_i32_0 : i32, i32
  }
  func.func @transform_5(%arg0: i32) -> (i32, i32) {
    %c0_i32 = arith.constant 0 : i32
    %c0_i32_0 = arith.constant 0 : i32
    return %arg0, %c0_i32 : i32, i32
  }
}

</mosaic_0001>

<bundles_post_ra>
// kernel: tpu_custom_call.1
= control target key start
LH: loop header
LB: loop body
LE: loop exit
PB: predicated region body
PF: predicated region fallthrough
CT: control target
= control target key end

     0   :  { %10 = vsyncpa [#allocation3], 0  ;;  %s1977_s0 = inlined_call_operand.hbm [shape: f32[16,32], index: 0, kind: input, shape index: {}]   ;;  %s1978_s1 = inlined_call_operand.hbm [shape: f32[32,96], index: 1, kind: input, shape index: {}]   ;;  %s1979_s2 = inlined_call_operand.vmem [shape: f32[1,96], index: 2, kind: input, shape index: {}]   ;;  %s1980_s3 = inlined_call_operand.hbm [shape: f32[32,32], index: 3, kind: input, shape index: {}]   ;;  %s1981_s4 = inlined_call_operand.vmem [shape: f32[1,32], index: 4, kind: input, shape index: {}]   ;;  %s1982_s5 = inlined_call_operand.hbm [shape: f32[16,32], index: 5, kind: output, shape index: {}]  }
   0x1   :  { %12 = vsyncpa [#allocation3 + $0x1], 0 }
   0x2   :  { %13 = vsyncpa [#allocation6], 0 }
   0x3   :  { %14 = vsyncpa [#allocation4], 0 }
   0x4   :  { %16 = vsyncpa [#allocation4 + $0x1], 0  ;;  %s1664_s18 = smov 0   ;;  %s1666_s19 = smov 0  }
   0x5   :  { %s1668_s20 = smov 0   ;;  %s1670_s21 = smov 0  }
   0x6 LB: > { %s1685_s22 = sadd.s32 4294967295, %s1615_s21   ;;  %s1231_s23 = sadd.s32 4294967294, %s1615_s21   ;;  %s1615_s21 = sphi %s1670_s21, %s2002_s21   ;;  %s1611_s20 = sphi %s1668_s20, %s2001_s20   ;;  %s1607_s19 = sphi %s1666_s19, %s2000_s19   ;;  %s1603_s18 = sphi %s1664_s18, %s1999_s18  }
   0x7   : > { %p42_p0 = scmp.ne.s32.totalorder %s1607_s19, %s1603_s18  ;;  %p1983_p1 = scmp.eq.s32.totalorder %s1685_s22, 0 }
   0x8   : > { %p156_p3 = scmp.eq.s32.totalorder %s1231_s23, 1  ;;  %p1232_p5 = scmp.ge.s32.totalorder %s1615_s21, 1 }
   0x9   : > { %p1694_p4 = por %p1983_p1, %p42_p0  ;;  %p163_p7 = scmp.lt.s32.totalorder %s1615_s21, 3 }
   0xa   : > { %p1699_p6 = por %p156_p3, %p42_p0  ;;  %s1617_s27 = smov [#allocation5]  }
   0xb   : > { %s1986_s24 = scalar_select %p1694_p4, 1, 0 }
   0xc   : > { %s1987_s25 = scalar_select %p1699_p6, 1, 0 }
   0xd   : > { %p1704_p8 = pnand %p1232_p5, %p163_p7  ;;  %s175_s28 = sshll.u32 %s1617_s27, 4  ;;  %s1708_s28 = int_to_ptr.vmem [resolvable:$true] %s175_s28 }
   0xe   : > { %s1618_s30 = smov [#allocation7]   ;;  %s1459_s9 = scalar_lea.hbm %s1978_s1, 512 }
   0xf   : > { %p1375_p9 = pneg %p1704_p8  ;;  %s191_s6 = sshll.u32 %s1618_s30, 4  ;;  %s1719_s6 = int_to_ptr.vmem [resolvable:$true] %s191_s6 }
  0x10   : > { %p1460_p12 = scmp.ne.s32.totalorder %s1978_s1, %s1459_s9  ;;  %p1466_p5 = scmp.lt.u32.totalorder %s1459_s9, %s1978_s1 }
  0x11   : > { %p1715_p11 = pnand %p1375_p9, %p1983_p1 }
  0x13   : > { %p1461_p13 = pneg %p1715_p11 }
  0x15   : > { %p1462_p0 = pnand %p1461_p13, %p1460_p12 }
  0x17   : > { %p1463_p3 = pneg %p1462_p0 }
  0x19   : > { %p1468_p7 = pnand %p1466_p5, %p1463_p3 }
  0x1b   : > { %1471 = shalt.err (!%p1468_p7)
}
  0x1c   : > { %s1472_s14 = scalar_lea.vmem %s1708_s28, 512  ;;  %p1480_p2 = scmp.lt.s32.totalorder %s1708_s28, %s1708_s28 }
  0x1d   : > { %p1473_p9 = scmp.ne.s32.totalorder %s1708_s28, %s1472_s14  ;;  %p1481_p12 = scmp.lt.s32.totalorder %s1472_s14, %s1472_s14 }
  0x1f   : > { %p1475_p10 = pnand %p1473_p9, %p1461_p13  ;;  %p1482_p0 = por %p1481_p12, %p1480_p2 }
  0x21   : > { %p1476_p1 = pneg %p1475_p10 }
  0x23   : > { %p1483_p6 = pnand %p1482_p0, %p1476_p1 }
  0x25   : > { %1486 = shalt.err (!%p1483_p6)
}
  0x26   : > { %s1619_s15 = smov 128   ;;  %s1620_s16 = smov 8  }
  0x27   : > { %1378 = dma.hbm_to_vmem [thread:$0]  (!%p1715_p11), %s1978_s1, 512, %s1708_s28, [#allocation6], %s1619_s15, %s1619_s15, %s1620_s16  }
  0x28   : > { %s1487_s7 = scalar_lea.hbm %s1980_s3, 512 }
  0x29   : > { %p1488_p2 = scmp.ne.s32.totalorder %s1980_s3, %s1487_s7  ;;  %p1494_p10 = scmp.lt.u32.totalorder %s1487_s7, %s1980_s3 }
  0x2b   : > { %p1490_p1 = pnand %p1488_p2, %p1461_p13 }
  0x2d   : > { %p1491_p6 = pneg %p1490_p1 }
  0x2f   : > { %p1496_p3 = pnand %p1494_p10, %p1491_p6 }
  0x31   : > { %1499 = shalt.err (!%p1496_p3)
}
  0x32   : > { %s1500_s28 = scalar_lea.vmem %s1719_s6, 512  ;;  %p1508_p12 = scmp.lt.s32.totalorder %s1719_s6, %s1719_s6 }
  0x33   : > { %p1501_p5 = scmp.ne.s32.totalorder %s1719_s6, %s1500_s28  ;;  %p1509_p0 = scmp.lt.s32.totalorder %s1500_s28, %s1500_s28 }
  0x35   : > { %p1503_p7 = pnand %p1501_p5, %p1461_p13  ;;  %p1510_p2 = por %p1509_p0, %p1508_p12 }
  0x37   : > { %p1504_p9 = pneg %p1503_p7 }
  0x39   : > { %p1511_p1 = pnand %p1510_p2, %p1504_p9 }
  0x3b   : > { %1514 = shalt.err (!%p1511_p1)
}
  0x3c   : > { %1381 = dma.hbm_to_vmem [thread:$0]  (!%p1715_p11), %s1980_s3, 512, %s1719_s6, [#allocation6], %s1619_s15, %s1619_s15, %s1620_s16  }
  0x3d   : > { %s1774_s14 = sadd.s32 1, %s1615_s21   ;;  %s29_s29 = sadd.s32 1, %s1611_s20 }
  0x3e   : > { %s26_s17 = ssub.s32 %s1615_s21, %s1774_s14  ;;  %p36_p13 = scmp.ne.s32.totalorder %s1611_s20, %s1607_s19 }
  0x3f   : > { %p27_p6 = scmp.eq.s32.totalorder %s26_s17, 0  ;;  %p37_p10 = scmp.eq.s32.totalorder %s1615_s21, 0 }
  0x40   : > { %p1990_p3 = scmp.eq.s32.totalorder %s1685_s22, 1  ;;  %p1392_p7 = scmp.lt.s32.totalorder %s1615_s21, 2 }
  0x41   : > { %s1790_s27 = scalar_select %p27_p6, %s1611_s20, %s29_s29  }
  0x42   : > { %p1784_p5 = por %p1990_p3, %p36_p13  ;;  %p38_p9 = por %p37_p10, %p36_p13 }
  0x43   : > { %s208_s30 = sand.u32 1, %s1611_s20   ;;  %s1237_s6 = sshll.u32 %s1615_s21, 7 }
  0x44   : > { %s1991_s23 = scalar_select %p1784_p5, 1, 0 }
  0x45   : > { %s1236_s7 = sshll.u32 %s208_s30, 3  ;;  %s1797_s8 = scalar_lea.hbm %s1977_s0, %s1237_s6 }
  0x46   : > { %s212_s9 = scalar_lea.vmem [#allocation2], %s1236_s7  ;;  %p1801_p11 = pnand %p1392_p7, %p38_p9 }
  0x47   : > { %s219_s10 = sshll.u32 %s212_s9, 4  ;;  %s209_s28 = scalar_lea.sflag [#allocation3], %s208_s30  ;;  %s1799_s10 = int_to_ptr.vmem [resolvable:$true] %s219_s10 }
  0x48   : > { %s1515_s12 = scalar_lea.hbm %s1797_s8, 128  ;;  %p1517_p0 = pneg %p1801_p11 }
  0x49   : > { %p1516_p12 = scmp.ne.s32.totalorder %s1797_s8, %s1515_s12  ;;  %s1520_s17 = scalar_lea.hbm %s1977_s0, 256 }
  0x4a   : > { %p1521_p13 = scmp.lt.u32.totalorder %s1797_s8, %s1977_s0  ;;  %p1522_p6 = scmp.lt.u32.totalorder %s1520_s17, %s1515_s12 }
  0x4b   : > { %p1518_p2 = pnand %p1517_p0, %p1516_p12  ;;  %p1524_p3 = scmp.lt.u32.totalorder %s1515_s12, %s1797_s8 }
  0x4c   : > { %p1523_p10 = por %p1522_p6, %p1521_p13 }
  0x4d   : > { %p1519_p1 = pneg %p1518_p2 }
  0x4e   : > { %p1525_p7 = por %p1524_p3, %p1523_p10 }
  0x50   : > { %p1526_p9 = pnand %p1525_p7, %p1519_p1 }
  0x52   : > { %1529 = shalt.err (!%p1526_p9)
}
  0x53   : > { %s1530_s30 = scalar_lea.vmem %s1799_s10, 128  ;;  %s1621_s15 = smov [#allocation2]  }
  0x54   : > { %p1531_p12 = scmp.ne.s32.totalorder %s1799_s10, %s1530_s30  ;;  %s1535_s16 = sshll.u32 %s1621_s15, 4  ;;  %s1536_s16 = int_to_ptr.vmem [resolvable:$false] %s1535_s16 }
  0x55   : > { %s1537_s9 = scalar_lea.vmem %s1536_s16, 256  ;;  %p1538_p4 = scmp.lt.s32.totalorder %s1799_s10, %s1536_s16 }
  0x56   : > { %p1533_p2 = pnand %p1531_p12, %p1517_p0  ;;  %p1539_p13 = scmp.lt.s32.totalorder %s1537_s9, %s1530_s30 }
  0x58   : > { %p1534_p5 = pneg %p1533_p2  ;;  %p1540_p6 = por %p1539_p13, %p1538_p4 }
  0x5a   : > { %p1541_p10 = pnand %p1540_p6, %p1534_p5 }
  0x5c   : > { %1544 = shalt.err (!%p1541_p10)
}
  0x5d   : > { %1385 = dma.hbm_to_vmem [thread:$0]  (!%p1801_p11), %s1797_s8, 128, %s1799_s10, %s209_s28  }
  0x5e   : > { %228 = sbr.rel (%p1704_p8) target bundleno = 1654 (0x676), region = 40  ;;  %s1833_s12 = sand.u32 (!%p1704_p8), 1, %s1607_s19  }
  0x5f   : > { %s1239_s13 = sshll.u32 (!%p1704_p8), %s1833_s12, 3  ;;  %s231_s29 = scalar_lea.sflag (!%p1704_p8), [#allocation3], %s1833_s12 }
  0x60   : > { %s234_s17 = scalar_lea.vmem (!%p1704_p8), [#allocation2], %s1239_s13  ;;  %p1993_p4 = scmp.ne.s32.totalorder (!%p1704_p8), %s1986_s24, 0 }
  0x65   : > { %1590 = dma.done.wait (%p1993_p4), %s231_s29, 128  }
  0x66   : > { %1592 = vsyncadd (%p1993_p4), %s231_s29, 4294967168  ;;  %p1994_p5 = scmp.eq.s32.totalorder %s1685_s22, 0 }
  0x68   : > { %1594 = dma.done.wait (%p1994_p5), [#allocation6], 1024   ;;  %p1995_p8 = pmov %p1994_p5 }
  0x69   : > { %v1622_v0 = vmov 0.0|0.0   ;;  %vm1623_vm0 = vmmov 0   ;;  %v1624_v1 = vmov 0.0   ;;  %v270_v2 = vld [vmem:[#allocation5] sm:$0xff]  ;;  %v271_v3 = vld [vmem:[#allocation5 + $0x8] sm:$0xff]  ;;  %v272_v4 = vld [vmem:[#allocation5 + $0x10] sm:$0xff]  ;;  %v362_v20 = vlaneseq }
  0x6a   : > { %1596 = vsyncadd (%p1995_p8), [#allocation6], 4294966272  ;;  %1351 = vmatprep.subr.bf16.mxu0 %v1622_v0  ;;  %1297 = vmatprep.mubr.msk.f32.mxu0 %vm1623_vm0, %v1624_v1  ;;  %v1352_v5 = vpack.c.bf16 %v271_v3, %v270_v2  ;;  %v273_v6 = vld [vmem:[#allocation5 + $0x18] sm:$0xff]  ;;  %vm281_vm1 = vcmask 261120   ;;  %v1243_v9 = vld [vmem:[%s1979_s2] ss:$0 sm:$0xff] }
  0x6b   : > { %1300 = vmatprep.subr.mxu1 %v1624_v1  ;;  %1302 = vmatprep.mubr.msk.f32.mxu1 %vm1623_vm0, %v1624_v1  ;;  %v1355_v7 = vpack.c.bf16 %v273_v6, %v272_v4  ;;  %v269_v8 = vld [vmem:[%s234_s17] sm:$0xff]  ;;  %s1625_s8 = smov 56   ;;  %s1626_s10 = smov 104   ;;  %vm369_vm2 = vcmask 64512   ;;  %v363_v21 = vshrl.u32 %v362_v20, 7  ;;  %v365_v22 = vand.u32 127, %v362_v20 }
  0x6c   : > { %1353 = vmatpush3.bf16.msra.mxu0 %v1352_v5  ;;  %s1627_s11 = smov 120   ;;  %s1628_s28 = smov 80   ;;  %vm1039_vm4 = vcmask 130048   ;;  %vm1041_vm5 = vcmask 195584  }
  0x6d   : > { %1354 = vmatprep.subr.bf16.mxu0 %v1622_v0  ;;  %vm366_vm3 = vcmp.ge.s32.totalorder %v363_v21, %v365_v22  ;;  %s1629_s7 = smov 112   ;;  %s1630_s6 = smov 8  }
  0x6e   : > { %s1631_s30 = smov 16   ;;  %s1632_s15 = smov 24  }
  0x6f   : > { %s1260_s29 = sshll.u32 %s1685_s22, 7  ;;  %s268_s17 = scalar_lea.vmem [#allocation8], %s1239_s13 }
  0x70   : > { %1356 = vmatpush3.bf16.msra.mxu0 %v1355_v7  ;;  %s1142_s24 = sshll.u32 %s268_s17, 4  ;;  %p1996_p0 = scmp.ne.s32.totalorder %s1991_s23, 0  ;;  %s1934_s24 = int_to_ptr.vmem [resolvable:$true] %s1142_s24 }
  0x71   : > { %1320 = vmatprep.subr.mxu0 %v1624_v1  ;;  %s1545_s22 = scalar_lea.vmem %s1934_s24, 128  ;;  %s1633_s13 = smov [#allocation8]  }
  0x72   : > { %p1546_p11 = scmp.ne.s32.totalorder %s1934_s24, %s1545_s22 }
  0x73   : > { %1298 = vmatmul.mubr.msk.f32.vlgmr.msra.gmra.mrb[0].mxu0 %vm281_vm1, %v269_v8 }
  0x74   : > { %1322 = vmatprep.mubr.msk.f32.mxu0 %vm1623_vm0, %v1624_v1  ;;  %p1547_p1 = pnand %p1546_p11, %p1996_p0 }
  0x76   : > { %p1548_p3 = pneg %p1547_p1 }
 0x146   : > { %v351_v10 = vpop.f32.mrb[0].mxu0 }
 0x147   : > { %v352_v11 = vadd.f32 %v1243_v9, %v351_v10  ;;  %v1299_v12 = vpop.f32.mrb[1].mxu0 }
 0x149   : > { %360 = vrot.lane.b32.xlu1 %v352_v11, %s1625_s8  ;;  %356 = vrot.lane.b32.xlu0 %v352_v11, %s1626_s10  ;;  %s1932_s10 = scalar_lea.hbm %s1982_s5, %s1260_s29 }
 0x14d   : > { %367 = vrot.lane.b32.xlu1 %v352_v11, %s1627_s11  ;;  %358 = vrot.lane.b32.xlu0 %v352_v11, %s1628_s28  ;;  %s1549_s28 = sshll.u32 %s1633_s13, 4  ;;  %s1550_s28 = int_to_ptr.vmem [resolvable:$false] %s1549_s28 }
 0x14e   : > { %p1552_p7 = scmp.lt.s32.totalorder %s1934_s24, %s1550_s28 }
 0x1bb   : > { %v1861_v13 = vpop.permute.xlu1 %360  ;;  %v357_v14 = vpop.permute.xlu0 %356 }
 0x1bc   : > { %444 = vrot.lane.b32.xlu0 %v357_v14, %s1627_s11 }
 0x1bf   : > { %v368_v15 = vpop.permute.xlu1 %367  ;;  %v1863_v16 = vpop.permute.xlu0 %358 }
 0x1c0   : > { %1301 = vmatpush3.xpose.msk.msra.mxu1 %vm369_vm2, %v368_v15  ;;  %596 = vrot.lane.b32.xlu0 %v1861_v13, %s1627_s11  ;;  %v1043_v15 = vld [vmem:[#allocation7] sm:$0xff] }
 0x1c1   : > { %520 = vrot.lane.b32.xlu1 %v1863_v16, %s1627_s11  ;;  %1305 = vmatprep.subr.mxu1 %v1624_v1  ;;  %s1129_s11 = scalar_lea.sflag [#allocation4], %s1833_s12 }
 0x1c3   : > { %1303 = vmatmul.mubr.msk.f32.vlgmr.msra.gmra.mrb[0].mxu1 %vm369_vm2, %v352_v11 }
 0x1c4   : > { %1307 = vmatprep.mubr.msk.f32.mxu1 %vm1623_vm0, %v1624_v1 }
 0x22e   : > { %v445_v17 = vpop.permute.xlu0 %444 }
 0x22f   : > { %1306 = vmatpush3.xpose.msk.msra.mxu1 %vm369_vm2, %v445_v17 }
 0x230   : > { %1310 = vmatprep.subr.mxu1 %v1624_v1 }
 0x232   : > { %1308 = vmatmul.mubr.msk.f32.vlgmr.msra.gmra.mrb[2].mxu1 %vm369_vm2, %v357_v14  ;;  %v597_v19 = vpop.permute.xlu0 %596 }
 0x233   : > { %v521_v18 = vpop.permute.xlu1 %520  ;;  %1312 = vmatprep.mubr.msk.f32.mxu1 %vm1623_vm0, %v1624_v1 }
 0x234   : > { %1311 = vmatpush3.xpose.msk.msra.mxu1 %vm369_vm2, %v521_v18  ;;  %v1045_v18 = vld [vmem:[#allocation7 + $0x10] sm:$0xff] }
 0x235   : > { %1315 = vmatprep.subr.mxu1 %v1624_v1 }
 0x237   : > { %1313 = vmatmul.mubr.msk.f32.vlgmr.msra.gmra.mrb[4].mxu1 %vm369_vm2, %v1863_v16 }
 0x238   : > { %1316 = vmatpush3.xpose.msk.msra.mxu1 %vm369_vm2, %v597_v19  ;;  %1317 = vmatprep.mubr.msk.f32.mxu1 %vm1623_vm0, %v1624_v1  ;;  %v1046_v19 = vld [vmem:[#allocation7 + $0x18] sm:$0xff] }
 0x239   : > { %1325 = vmatprep.subr.mxu1 %v1624_v1  ;;  %v1361_v20 = vpack.c.bf16 %v1046_v19, %v1045_v18 }
 0x23b   : > { %1318 = vmatmul.mubr.msk.f32.vlgmr.msra.gmra.mrb[6].mxu1 %vm369_vm2, %v1861_v13 }
 0x23c   : > { %1327 = vmatprep.mubr.msk.f32.mxu1 %vm1623_vm0, %v1624_v1 }
 0x296   : > { %v440_v23 = vpop.f32.mrb[0].mxu1 }
 0x297   : > { %v674_v24 = vsel %vm366_vm3, %v440_v23, -1e+30  ;;  %v1304_v25 = vpop.f32.mrb[1].mxu1 }
 0x298   : > { %v678_v26 = vsel %vm369_vm2, %v674_v24, -inf }
 0x299   : > { %679 = vmax.xlane.f32.xlu1 %v678_v26 }
 0x305   : > { %v516_v27 = vpop.f32.mrb[2].mxu1 }
 0x306   : > { %v675_v28 = vsel %vm366_vm3, %v516_v27, -1e+30  ;;  %v1309_v29 = vpop.f32.mrb[3].mxu1 }
 0x307   : > { %v681_v30 = vsel %vm369_vm2, %v675_v28, -inf }
 0x308   : > { %682 = vmax.xlane.f32.xlu0 %v681_v30 }
 0x30a   : > { %v592_v31 = vpop.f32.mrb[4].mxu1 }
 0x30b   : > { %v676_v32 = vsel %vm366_vm3, %v592_v31, -1e+30  ;;  %v1314_v33 = vpop.f32.mrb[5].mxu1  ;;  %v1257_v31 = vld [vmem:[%s1981_s4] ss:$0 sm:$0xff] }
 0x30c   : > { %v684_v34 = vsel %vm369_vm2, %v676_v32, -inf }
 0x30d   : > { %685 = vmax.xlane.f32.xlu0 %v684_v34 }
 0x30e   : > { %v668_v35 = vpop.f32.mrb[6].mxu1 }
 0x30f   : > { %v677_v36 = vsel %vm366_vm3, %v668_v35, -1e+30  ;;  %v1319_v37 = vpop.f32.mrb[7].mxu1 }
 0x310   : > { %v687_v38 = vsel %vm369_vm2, %v677_v36, -inf }
 0x311   : > { %688 = vmax.xlane.f32.xlu1 %v687_v38 }
 0x322   : > { %798 = vrot.lane.b32.xlu1 %v357_v14, %s1629_s7 }
 0x323   : > { %722 = vrot.lane.b32.xlu0 %v352_v11, %s1629_s7 }
 0x326   : > { %v680_v39 = vpop.xlane.xlu1 %679 }
 0x327   : > { %v690_v40 = vsub.f32 %v674_v24, %v680_v39 }
 0x329   : > { %v694_v41 = vmul.f32 1.442695, %v690_v40 }
 0x32b   : > { %1443 = vpow2.f32 %v694_v41 }
 0x335   : > { %v1444_v42 = vpop.eup %1443 }
 0x336   : > { %v702_v43 = vsel %vm369_vm2, %v1444_v42, 0.0 }
 0x342   : > { %703 = vadd.xlane.f32.xlu0 %v702_v43 }
 0x395   : > { %v683_v44 = vpop.xlane.xlu0 %682 }
 0x396   : > { %v691_v45 = vsub.f32 %v675_v28, %v683_v44 }
 0x398   : > { %v696_v46 = vmul.f32 1.442695, %v691_v45 }
 0x39a   : > { %1445 = vpow2.f32 %v696_v46  ;;  %v686_v47 = vpop.xlane.xlu0 %685 }
 0x39b   : > { %v692_v48 = vsub.f32 %v676_v32, %v686_v47 }
 0x39d   : > { %v698_v49 = vmul.f32 1.442695, %v692_v48 }
 0x39e   : > { %v689_v50 = vpop.xlane.xlu1 %688  ;;  %v723_v51 = vpop.permute.xlu0 %722 }
 0x39f   : > { %1447 = vpow2.f32 %v698_v49  ;;  %v693_v52 = vsub.f32 %v677_v36, %v689_v50  ;;  %1321 = vmatpush3.msra.mxu0 %v723_v51 }
 0x3a0   : > { %1330 = vmatprep.subr.mxu0 %v1624_v1 }
 0x3a1   : > { %v700_v53 = vmul.f32 1.442695, %v693_v52 }
 0x3a2   : > { %v799_v54 = vpop.permute.xlu1 %798 }
 0x3a3   : > { %1449 = vpow2.f32 %v700_v53  ;;  %1326 = vmatpush3.msra.mxu1 %v799_v54 }
 0x3a4   : > { %v1446_v55 = vpop.eup %1445  ;;  %1335 = vmatprep.subr.mxu1 %v1624_v1 }
 0x3a5   : > { %v705_v56 = vsel %vm369_vm2, %v1446_v55, 0.0 }
 0x3a6   : > { %706 = vadd.xlane.f32.xlu1 %v705_v56 }
 0x3a9   : > { %v1448_v57 = vpop.eup %1447 }
 0x3aa   : > { %v708_v58 = vsel %vm369_vm2, %v1448_v57, 0.0 }
 0x3ab   : > { %709 = vadd.xlane.f32.xlu0 %v708_v58 }
 0x3ad   : > { %v1450_v59 = vpop.eup %1449 }
 0x3ae   : > { %v711_v60 = vsel %vm369_vm2, %v1450_v59, 0.0 }
 0x3af   : > { %712 = vadd.xlane.f32.xlu1 %v711_v60 }
 0x3c0   : > { %874 = vrot.lane.b32.xlu1 %v1863_v16, %s1629_s7  ;;  %v1044_v16 = vld [vmem:[#allocation7 + $0x8] sm:$0xff] }
 0x3c1   : > { %950 = vrot.lane.b32.xlu0 %v1861_v13, %s1629_s7  ;;  %v1358_v17 = vpack.c.bf16 %v1044_v16, %v1043_v15  ;;  %s1551_s7 = scalar_lea.vmem %s1550_s28, 256 }
 0x3c2   : > { %p1553_p9 = scmp.lt.s32.totalorder %s1551_s7, %s1545_s22 }
 0x3c4   : > { %p1554_p12 = por %p1553_p9, %p1552_p7 }
 0x3c6   : > { %p1555_p2 = pnand %p1554_p12, %p1548_p3 }
 0x3cf   : > { %v704_v61 = vpop.xlane.xlu0 %703 }
 0x3d0   : > { %1451 = vrcp.f32 %v704_v61 }
 0x3da   : > { %v1452_v62 = vpop.eup %1451 }
 0x3db   : > { %v718_v63 = vmul.f32 %v1452_v62, %v1444_v42 }
 0x3dd   : > { %1323 = vmatmul.mubr.msk.f32.vlgmr.msra.gmra.mrb[2].mxu0 %vm369_vm2, %v718_v63 }
 0x3de   : > { %1332 = vmatprep.mubr.msk.f32.mxu0 %vm1623_vm0, %v1624_v1 }
 0x433   : > { %v707_v2 = vpop.xlane.xlu1 %706 }
 0x434   : > { %1453 = vrcp.f32 %v707_v2 }
 0x438   : > { %v710_v3 = vpop.xlane.xlu0 %709 }
 0x439   : > { %1455 = vrcp.f32 %v710_v3 }
 0x43c   : > { %v713_v4 = vpop.xlane.xlu1 %712  ;;  %v951_v8 = vpop.permute.xlu0 %950 }
 0x43d   : > { %1457 = vrcp.f32 %v713_v4 }
 0x43e   : > { %v1454_v5 = vpop.eup %1453 }
 0x43f   : > { %v719_v6 = vmul.f32 %v1454_v5, %v1446_v55 }
 0x440   : > { %v875_v7 = vpop.permute.xlu1 %874 }
 0x441   : > { %1331 = vmatpush3.msra.mxu0 %v875_v7  ;;  %1328 = vmatmul.mubr.msk.f32.vlgmr.msra.gmra.mrb[8].mxu1 %vm369_vm2, %v719_v6 }
 0x442   : > { %1336 = vmatpush3.msra.mxu1 %v951_v8  ;;  %1337 = vmatprep.mubr.msk.f32.mxu1 %vm1623_vm0, %v1624_v1 }
 0x443   : > { %v1456_v9 = vpop.eup %1455  ;;  %1357 = vmatprep.subr.bf16.mxu0 %v1622_v0 }
 0x444   : > { %v720_v10 = vmul.f32 %v1456_v9, %v1448_v57 }
 0x446   : > { %1333 = vmatmul.mubr.msk.f32.vlgmr.msra.gmra.mrb[4].mxu0 %vm369_vm2, %v720_v10 }
 0x447   : > { %v1458_v11 = vpop.eup %1457  ;;  %1348 = vmatprep.mubr.msk.f32.mxu0 %vm1623_vm0, %v1624_v1  ;;  %1359 = vmatpush3.bf16.msra.mxu0 %v1358_v17 }
 0x448   : > { %v721_v12 = vmul.f32 %v1458_v11, %v1450_v59  ;;  %1360 = vmatprep.subr.bf16.mxu0 %v1622_v0 }
 0x44a   : > { %1338 = vmatmul.mubr.msk.f32.vlgmr.msra.gmra.mrb[10].mxu1 %vm369_vm2, %v721_v12 }
 0x44b   : > { %1362 = vmatpush3.bf16.msra.mxu0 %v1361_v20 }
 0x4b0   : > { %v794_v13 = vpop.f32.mrb[2].mxu0 }
 0x4b1   : > { %v1324_v14 = vpop.f32.mrb[3].mxu0 }
 0x514   : > { %v870_v21 = vpop.f32.mrb[8].mxu1 }
 0x515   : > { %1027 = vrot.lane.b32.xlu1 %v870_v21, %s1630_s6  ;;  %v1329_v22 = vpop.f32.mrb[9].mxu1 }
 0x519   : > { %v946_v1 = vpop.f32.mrb[4].mxu0 }
 0x51a   : > { %1031 = vrot.lane.b32.xlu0 %v946_v1, %s1631_s30  ;;  %v1334_v23 = vpop.f32.mrb[5].mxu0 }
 0x51d   : > { %v1022_v24 = vpop.f32.mrb[10].mxu1 }
 0x51e   : > { %1035 = vrot.lane.b32.xlu1 %v1022_v24, %s1632_s15  ;;  %v1339_v25 = vpop.f32.mrb[11].mxu1 }
 0x587   : > { %v1028_v26 = vpop.permute.xlu1 %1027 }
 0x588   : > { %v1038_v27 = vsel %vm369_vm2, %v794_v13, %v1028_v26 }
 0x58c   : > { %v1032_v0 = vpop.permute.xlu0 %1031 }
 0x58d   : > { %v1040_v28 = vsel %vm1039_vm4, %v1038_v27, %v1032_v0 }
 0x590   : > { %v1036_v29 = vpop.permute.xlu1 %1035 }
 0x591   : > { %v1042_v30 = vsel %vm1041_vm5, %v1040_v28, %v1036_v29 }
 0x592   : > { %1349 = vmatmul.mubr.msk.f32.vlgmr.msra.gmra.mrb[6].mxu0 %vm281_vm1, %v1042_v30 }
 0x665   : > { %v1123_v32 = vpop.f32.mrb[6].mxu0 }
 0x666   : > { %v1124_v33 = vadd.f32 %v1257_v31, %v1123_v32  ;;  %v1350_v34 = vpop.f32.mrb[7].mxu0 }
 0x668   : > { %1127 = vst.msk [vmem:[%s268_s17] sm:$0xff] %vm281_vm1, %v1124_v33 }
 0x669   : > { %1558 = shalt.err (!%p1555_p2)
}
 0x66a   : > { %s1559_s12 = scalar_lea.hbm %s1932_s10, 128  ;;  %s1563_s15 = scalar_lea.hbm %s1982_s5, 256 }
 0x66b   : > { %p1560_p13 = scmp.ne.s32.totalorder %s1932_s10, %s1559_s12  ;;  %p1564_p4 = scmp.lt.u32.totalorder %s1932_s10, %s1982_s5 }
 0x66c   : > { %p1565_p5 = scmp.lt.u32.totalorder %s1563_s15, %s1559_s12  ;;  %p1567_p11 = scmp.lt.u32.totalorder %s1559_s12, %s1932_s10 }
 0x66d   : > { %p1561_p6 = pnand %p1560_p13, %p1996_p0 }
 0x66e   : > { %p1566_p8 = por %p1565_p5, %p1564_p4 }
 0x66f   : > { %p1562_p10 = pneg %p1561_p6 }
 0x670   : > { %p1568_p1 = por %p1567_p11, %p1566_p8 }
 0x672   : > { %p1569_p3 = pnand %p1568_p1, %p1562_p10 }
 0x674   : > { %1572 = shalt.err (!%p1569_p3)
}
 0x675   : > { %1373 = dma.vmem_to_hbm [thread:$0]  (%p1996_p0), %s1934_s24, 128, %s1932_s10, %s1129_s11  }
 0x676 PF: > { %s1154_s29 = sand.u32 1, %s1603_s18   ;;  %p1997_p7 = scmp.ne.s32.totalorder %s1987_s25, 0 }
 0x677   : > { %p1998_p9 = scmp.ge.s32.totalorder %s1615_s21, 2  ;;  %s1155_s17 = scalar_lea.sflag [#allocation4], %s1154_s29 }
 0x679   : > { %p1387_p12 = pnand %p1998_p9, %p1997_p7 }
 0x67b   : > { %1598 = dma.done.wait (!%p1387_p12), %s1155_s17, 128  }
 0x67c   : > { %1600 = vsyncadd (!%p1387_p12), %s1155_s17, 4294967168  ;;  %p19_p2 = scmp.ge.s32.totalorder %s1774_s14, 4   ;;  %s1999_s18 = smov %s1607_s19 }
 0x67d   : > { %s2000_s19 = smov %s1611_s20  ;;  %s2001_s20 = smov %s1790_s27 }
 0x67e   : > { %s2002_s21 = smov %s1774_s14  ;;  %21 = sbr.rel (!%p19_p2) target bundleno = 6 (0x6), region = 93 }
 0x685   :  { %1160 = vsyncpa [#allocation3], 1 }
 0x686   :  { %1162 = vsyncpa [#allocation3 + $0x1], 1 }
 0x687   :  { %1163 = vsyncpa [#allocation6], 1 }
 0x688   :  { %1164 = vsyncpa [#allocation4], 1 }
 0x689   :  { %1166 = vsyncpa [#allocation4 + $0x1], 1 }

</bundles_post_ra>
